<compile_context>
chip_gen: v7x
topology: tpu7x:2x2x1
jax: 0.10.0
libtpu: 0.0.40
codegen_flags: <defaults>
</compile_context>

<pallas_src>
import functools

import jax
import jax.numpy as jnp
import numpy as np
from jax import lax
from jax.experimental import pallas as pl
from jax.experimental.pallas import tpu as pltpu


# ---------------------------------------------------------------------------
# Pallas kernel: fused 3x3 high-pass stencil + scale, halo handled in-kernel
# ---------------------------------------------------------------------------
def _highpass_kernel(x_ref, o_ref, *, inv_w):
    """x_ref/o_ref: (bc, H, W) slabs of independent channel planes.

    out = (9*x - box3x3(x)) * inv_w, zero boundary, computed separably:
    row-direction 3-tap sum (sublane shifts), then column-direction 3-tap sum
    (lane shifts).  Boundary zeros come from concatenating a zero row/column
    with the shifted slab -- no padded HBM copy, no unaligned W+2 blocks.
    """
    bc, H, W = o_ref.shape
    xf = x_ref[...].astype(jnp.float32)          # no-op for f32 inputs

    # Vertical (sublane-axis) 3-tap sum with zero boundary.
    zrow = jnp.zeros((bc, 1, W), jnp.float32)
    rs = xf + jnp.concatenate([xf[:, 1:, :], zrow], axis=1)     # + x[i+1, j]
    rs = rs + jnp.concatenate([zrow, xf[:, :-1, :]], axis=1)    # + x[i-1, j]

    # Horizontal (lane-axis) 3-tap sum with zero boundary.
    zcol = jnp.zeros((bc, H, 1), jnp.float32)
    box = rs + jnp.concatenate([rs[:, :, 1:], zcol], axis=2)    # + rs[i, j+1]
    box = box + jnp.concatenate([zcol, rs[:, :, :-1]], axis=2)  # + rs[i, j-1]

    o_ref[...] = ((9.0 * xf - box) * inv_w).astype(o_ref.dtype)


# ---------------------------------------------------------------------------
# Tiling plan (chip-generation aware, defensive fallbacks)
# ---------------------------------------------------------------------------
def _tpu_plan():
    """Per-generation input-block budget, minimum grid steps, VMEM limit."""
    kind = ""
    try:
        kind = jax.devices()[0].device_kind.lower()
    except Exception:
        pass
    if "v5 lite" in kind or "v5e" in kind or "v5lite" in kind:
        # v5e: 16 MiB scoped-VMEM default -> keep 2 MiB blocks, raise limit.
        return {"budget": 2 << 20, "min_steps": 1, "vmem_limit": 32 << 20}
    if "v7" in kind:
        # v7x: 64 MiB physical VMEM, 2 TCs -> >=4 steps (>=2 per core).
        return {"budget": 4 << 20, "min_steps": 4, "vmem_limit": 48 << 20}
    if "v6" in kind:
        # v6e: single TC, 128 MiB VMEM -> big blocks, no forced splitting.
        return {"budget": 4 << 20, "min_steps": 1, "vmem_limit": 64 << 20}
    # Unknown / other generations: conservative middle ground.
    return {"budget": 4 << 20, "min_steps": 2, "vmem_limit": 64 << 20}


def _choose_bc(nc, h, w, itemsize, budget, min_steps):
    """Channel-planes per grid step: fill ~budget bytes of input, but keep at
    least `min_steps` grid steps when the workload allows it."""
    per_plane = max(1, h * w * itemsize)
    bc = max(1, min(nc, budget // per_plane))
    if min_steps > 1 and nc >= min_steps:
        bc = min(bc, pl.cdiv(nc, min_steps))
    return bc


# ---------------------------------------------------------------------------
# Wrapper
# ---------------------------------------------------------------------------
def highpass_forward(x_nchw, w_hpf):
    """HighPass.forward: depthwise 3x3 high-pass filter, padding=1. x: NCHW."""
    n, c, h, w = x_nchw.shape
    inv_w = 1.0 / float(w_hpf)   # fixed at module construction -> static is fine

    nc = n * c
    x_flat = x_nchw.reshape(nc, h, w)            # metadata-only reshape

    plan = _tpu_plan()
    bc = _choose_bc(nc, h, w, x_nchw.dtype.itemsize,
                    plan["budget"], plan["min_steps"])
    grid = (pl.cdiv(nc, bc),)                    # ragged last block is fine

    out = pl.pallas_call(
        functools.partial(_highpass_kernel, inv_w=inv_w),
        out_shape=jax.ShapeDtypeStruct((nc, h, w), x_nchw.dtype),
        grid_spec=pl.GridSpec(
            grid=grid,
            in_specs=[pl.BlockSpec((bc, h, w), lambda i: (i, 0, 0))],
            out_specs=pl.BlockSpec((bc, h, w), lambda i: (i, 0, 0)),
        ),
        compiler_params=pltpu.CompilerParams(
            dimension_semantics=("parallel",),
            vmem_limit_bytes=plan["vmem_limit"],
        ),
    )(x_flat)
    return out.reshape(n, c, h, w)


# ---------------------------------------------------------------------------
# Pure-JAX reference (mirrors the PyTorch module: grouped conv2d, padding=1)
# ---------------------------------------------------------------------------
def reference_highpass(x_nchw, w_hpf):
    n, c, h, w = x_nchw.shape
    filt = jnp.array([[-1.0, -1.0, -1.0],
                      [-1.0, 8.0, -1.0],
                      [-1.0, -1.0, -1.0]], jnp.float32) / float(w_hpf)
    k = jnp.tile(filt.reshape(3, 3, 1, 1), (1, 1, 1, c))        # HWIO, depthwise
    return lax.conv_general_dilated(
        x_nchw, k, window_strides=(1, 1), padding=[(1, 1), (1, 1)],
        dimension_numbers=('NCHW', 'HWIO', 'NCHW'),
        feature_group_count=c)


# ---------------------------------------------------------------------------
if __name__ == "__main__":
    key = jax.random.PRNGKey(0)
    x = jax.random.normal(key, (2, 4, 16, 16), jnp.float32)     # N,C,H,W
    w_hpf = 1.0

    fwd = jax.jit(highpass_forward, static_argnames=("w_hpf",))
    out = jax.block_until_ready(fwd(x, w_hpf=w_hpf))
    ref = jax.block_until_ready(reference_highpass(x, w_hpf))

    assert out.shape == x.shape
    np.testing.assert_allclose(np.asarray(out), np.asarray(ref),
                               rtol=1e-4, atol=1e-4)
    print("KERNEL_OK")
</pallas_src>

<mosaic_0001>
module attributes {stable_mosaic.version = 11 : i64} {
  func.func @_highpass_kernel(%arg0: i32, %arg1: memref<4x16x16xf32, #tpu.memory_space<vmem>>, %arg2: memref<4x16x16xf32, #tpu.memory_space<vmem>>) attributes {dimension_semantics = [#tpu.dimension_semantics<parallel>], iteration_bounds = array<i64: 2>, scalar_prefetch = 0 : i64, scratch_operands = 0 : i64, tpu.core_type = #tpu.core_type<tc>, window_params = [{transform_indices = @transform_0, window_bounds = array<i64: 4, 16, 16>}, {transform_indices = @transform_1, window_bounds = array<i64: 4, 16, 16>}]} {
    %c0 = arith.constant 0 : index
    %c0_0 = arith.constant 0 : index
    %c0_1 = arith.constant 0 : index
    %0 = vector.load %arg1[%c0, %c0_0, %c0_1] : memref<4x16x16xf32, #tpu.memory_space<vmem>>, vector<4x16x16xf32>
    %cst = arith.constant 0.000000e+00 : f32
    %1 = vector.broadcast %cst : f32 to vector<4x1x16xf32>
    %2 = vector.extract_strided_slice %0 {offsets = [0, 1, 0], sizes = [4, 15, 16], strides = [1, 1, 1]} : vector<4x16x16xf32> to vector<4x15x16xf32>
    %3 = tpu.concatenate %2, %1 in 1 : vector<4x15x16xf32>, vector<4x1x16xf32> -> vector<4x16x16xf32>
    %4 = arith.addf %0, %3 : vector<4x16x16xf32>
    %5 = vector.extract_strided_slice %0 {offsets = [0, 0, 0], sizes = [4, 15, 16], strides = [1, 1, 1]} : vector<4x16x16xf32> to vector<4x15x16xf32>
    %6 = tpu.concatenate %1, %5 in 1 : vector<4x1x16xf32>, vector<4x15x16xf32> -> vector<4x16x16xf32>
    %7 = arith.addf %4, %6 : vector<4x16x16xf32>
    %cst_2 = arith.constant 0.000000e+00 : f32
    %8 = vector.broadcast %cst_2 : f32 to vector<4x16x1xf32>
    %9 = vector.extract_strided_slice %7 {offsets = [0, 0, 1], sizes = [4, 16, 15], strides = [1, 1, 1]} : vector<4x16x16xf32> to vector<4x16x15xf32>
    %10 = tpu.concatenate %9, %8 in 2 : vector<4x16x15xf32>, vector<4x16x1xf32> -> vector<4x16x16xf32>
    %11 = arith.addf %7, %10 : vector<4x16x16xf32>
    %12 = vector.extract_strided_slice %7 {offsets = [0, 0, 0], sizes = [4, 16, 15], strides = [1, 1, 1]} : vector<4x16x16xf32> to vector<4x16x15xf32>
    %13 = tpu.concatenate %8, %12 in 2 : vector<4x16x1xf32>, vector<4x16x15xf32> -> vector<4x16x16xf32>
    %14 = arith.addf %11, %13 : vector<4x16x16xf32>
    %cst_3 = arith.constant 9.000000e+00 : f32
    %15 = vector.broadcast %cst_3 : f32 to vector<4x16x16xf32>
    %16 = arith.mulf %15, %0 : vector<4x16x16xf32>
    %17 = arith.subf %16, %14 : vector<4x16x16xf32>
    %cst_4 = arith.constant 1.000000e+00 : f32
    %18 = vector.broadcast %cst_4 : f32 to vector<4x16x16xf32>
    %19 = arith.mulf %17, %18 : vector<4x16x16xf32>
    %c0_5 = arith.constant 0 : index
    %c0_6 = arith.constant 0 : index
    %c0_7 = arith.constant 0 : index
    %20 = vector.load %arg2[%c0_5, %c0_6, %c0_7] : memref<4x16x16xf32, #tpu.memory_space<vmem>>, vector<4x16x16xf32>
    tpu.vector_store %arg2[%c0_5, %c0_6, %c0_7], %19 {strides = array<i32>} : memref<4x16x16xf32, #tpu.memory_space<vmem>>, vector<4x16x16xf32>,
    return
  }
  func.func @transform_0(%arg0: i32) -> (i32, i32, i32) {
    %c0_i32 = arith.constant 0 : i32
    %c0_i32_0 = arith.constant 0 : i32
    %c0_i32_1 = arith.constant 0 : i32
    return %arg0, %c0_i32, %c0_i32_0 : i32, i32, i32
  }
  func.func @transform_1(%arg0: i32) -> (i32, i32, i32) {
    %c0_i32 = arith.constant 0 : i32
    %c0_i32_0 = arith.constant 0 : i32
    %c0_i32_1 = arith.constant 0 : i32
    return %arg0, %c0_i32, %c0_i32_0 : i32, i32, i32
  }
}

</mosaic_0001>

<bundles_post_ra>
// kernel: highpass_forward.1
= control target key start
LH: loop header
LB: loop body
LE: loop exit
PB: predicated region body
PF: predicated region fallthrough
CT: control target
= control target key end

     0   :  { %6 = vsyncpa [#allocation3], 0  ;;  %s916_s0 = inlined_call_operand.hbm [shape: f32[8,16,16], index: 0, kind: input, shape index: {}]   ;;  %s917_s1 = inlined_call_operand.hbm [shape: f32[8,16,16], index: 1, kind: output, shape index: {}]  }
   0x1   :  { %8 = vsyncpa [#allocation3 + $0x1], 0 }
   0x2   :  { %9 = vsyncpa [#allocation4], 0 }
   0x3   :  { %11 = vsyncpa [#allocation4 + $0x1], 0  ;;  %s611_s6 = smov 0   ;;  %s613_s7 = smov 0  }
   0x4   :  { %s615_s8 = smov 0   ;;  %s617_s9 = smov 0  }
   0x5 LB: > { %s632_s10 = sadd.s32 4294967295, %s591_s9   ;;  %s423_s11 = sadd.s32 4294967294, %s591_s9   ;;  %s591_s9 = sphi %s617_s9, %s930_s9   ;;  %s587_s8 = sphi %s615_s8, %s929_s8   ;;  %s583_s7 = sphi %s613_s7, %s928_s7   ;;  %s579_s6 = sphi %s611_s6, %s927_s6  }
   0x6   : > { %s636_s12 = sadd.s32 1, %s591_s9   ;;  %s24_s13 = sadd.s32 1, %s587_s8 }
   0x7   : > { %s21_s14 = ssub.s32 %s591_s9, %s636_s12  ;;  %p31_p0 = scmp.ne.s32.totalorder %s587_s8, %s583_s7 }
   0x8   : > { %p22_p1 = scmp.eq.s32.totalorder %s21_s14, 0  ;;  %p32_p2 = scmp.eq.s32.totalorder %s591_s9, 0 }
   0x9   : > { %p37_p3 = scmp.ne.s32.totalorder %s583_s7, %s579_s6  ;;  %p38_p4 = scmp.eq.s32.totalorder %s632_s10, 0 }
   0xa   : > { %s648_s15 = scalar_select %p22_p1, %s587_s8, %s24_s13  }
   0xb   : > { %p650_p5 = por %p32_p2, %p31_p0  ;;  %p654_p6 = por %p38_p4, %p37_p3 }
   0xc   : > { %p61_p7 = scmp.eq.s32.totalorder %s632_s10, 1  ;;  %p67_p8 = scmp.eq.s32.totalorder %s423_s11, 1 }
   0xd   : > { %p455_p10 = scmp.lt.s32.totalorder %s591_s9, 2  ;;  %s87_s20 = sand.u32 1, %s587_s8  }
   0xe   : > { %p661_p11 = por %p61_p7, %p31_p0  ;;  %p665_p12 = por %p67_p8, %p37_p3 }
   0xf   : > { %s440_s21 = sshll.u32 %s591_s9, 10  ;;  %s426_s22 = sshll.u32 %s87_s20, 6 }
  0x10   : > { %s921_s18 = scalar_select %p661_p11, 1, 0 }
  0x11   : > { %s922_s19 = scalar_select %p665_p12, 1, 0 }
  0x12   : > { %s674_s25 = scalar_lea.hbm %s916_s0, %s440_s21  ;;  %s91_s26 = scalar_lea.vmem [#allocation2], %s426_s22 }
  0x13   : > { %s99_s27 = sshll.u32 %s91_s26, 4  ;;  %p678_p13 = pnand %p455_p10, %p650_p5  ;;  %s682_s27 = int_to_ptr.vmem [resolvable:$true] %s99_s27 }
  0x14   : > { %s684_s29 = scalar_lea.sflag [#allocation3], %s87_s20  ;;  %s495_s30 = scalar_lea.hbm %s674_s25, 1024 }
  0x15   : > { %p496_p0 = scmp.ne.s32.totalorder %s674_s25, %s495_s30  ;;  %p497_p1 = pneg %p678_p13 }
  0x16   : > { %s500_s4 = scalar_lea.hbm %s916_s0, 2048  ;;  %p501_p4 = scmp.lt.u32.totalorder %s674_s25, %s916_s0 }
  0x17   : > { %p498_p2 = pnand %p497_p1, %p496_p0  ;;  %p502_p5 = scmp.lt.u32.totalorder %s500_s4, %s495_s30 }
  0x18   : > { %p504_p8 = scmp.lt.u32.totalorder %s495_s30, %s674_s25 }
  0x19   : > { %p499_p3 = pneg %p498_p2  ;;  %p503_p7 = por %p502_p5, %p501_p4 }
  0x1b   : > { %p505_p10 = por %p504_p8, %p503_p7 }
  0x1d   : > { %p506_p9 = pnand %p505_p10, %p499_p3 }
  0x1f   : > { %509 = shalt.err (!%p506_p9)
}
  0x20   : > { %s510_s13 = scalar_lea.vmem %s682_s27, 1024  ;;  %s593_s14 = smov [#allocation2]  }
  0x21   : > { %p511_p0 = scmp.ne.s32.totalorder %s682_s27, %s510_s13  ;;  %s515_s16 = sshll.u32 %s593_s14, 4  ;;  %s516_s16 = int_to_ptr.vmem [resolvable:$false] %s515_s16 }
  0x22   : > { %s517_s20 = scalar_lea.vmem %s516_s16, 2048  ;;  %p518_p11 = scmp.lt.s32.totalorder %s682_s27, %s516_s16 }
  0x23   : > { %p513_p2 = pnand %p511_p0, %p497_p1  ;;  %p519_p4 = scmp.lt.s32.totalorder %s517_s20, %s510_s13 }
  0x25   : > { %p514_p12 = pneg %p513_p2  ;;  %p520_p5 = por %p519_p4, %p518_p11 }
  0x27   : > { %p521_p7 = pnand %p520_p5, %p514_p12 }
  0x29   : > { %524 = shalt.err (!%p521_p7)
}
  0x2a   : > { %s594_s21 = smov 128   ;;  %s595_s22 = smov 8  }
  0x2b   : > { %450 = dma.hbm_to_vmem [thread:$0]  (!%p678_p13), %s674_s25, 1024, %s682_s27, %s684_s29, %s594_s21, %s594_s21, %s595_s22  }
  0x2c   : > { %p430_p9 = scmp.ge.s32.totalorder %s591_s9, 1  ;;  %p107_p1 = scmp.lt.s32.totalorder %s591_s9, 3 }
  0x2e   : > { %p108_p3 = pnand %p430_p9, %p107_p1 }
  0x2f   : > { %s715_s23 = sand.u32 (!%p108_p3), 1, %s583_s7  }
  0x30   : > { %111 = sbr.rel (%p108_p3) target bundleno = 228 (0xe4), region = 24  ;;  %s431_s24 = sshll.u32 (!%p108_p3), %s715_s23, 6 }
  0x31   : > { %s114_s26 = scalar_lea.sflag (!%p108_p3), [#allocation3], %s715_s23  ;;  %s721_s30 = scalar_lea.vmem (!%p108_p3), [#allocation2], %s431_s24 }
  0x37   : > { %570 = dma.done.wait (%p654_p6), %s114_s26, 1024  }
  0x38   : > { %572 = vsyncadd (%p654_p6), %s114_s26, 4294966272  ;;  %v728_v0 = vld [vmem:[%s721_s30 + $0x10] sm:$0xff]  ;;  %v731_v1 = vld [vmem:[%s721_s30 + $0x18] sm:$0xff]  ;;  %vm154_vm0 = vcmask 1046528   ;;  %vm187_vm1 = vcmask 1040384   ;;  %s596_s17 = smov 127  }
  0x39   : > { %v734_v2 = vld [vmem:[%s721_s30] sm:$0xff]  ;;  %v158_v3 = vrot.slane %v728_v0, 1  ;;  %v159_v4 = vrot.slane %v731_v1, 1  ;;  %v191_v5 = vrot.slane %v728_v0, 7  ;;  %v740_v6 = vld [vmem:[%s721_s30 + $0x8] sm:$0xff]  ;;  %v192_v10 = vrot.slane %v731_v1, 7 }
  0x3a   : > { %v155_v7 = vrot.slane %v734_v2, 1  ;;  %v156_v8 = vrot.slane %v740_v6, 1  ;;  %v188_v9 = vrot.slane %v734_v2, 7  ;;  %v189_v11 = vrot.slane %v740_v6, 7  ;;  %v748_v12 = vld [vmem:[%s721_s30 + $0x28] sm:$0xff]  ;;  %v763_v25 = vld [vmem:[%s721_s30 + $0x20] sm:$0xff] }
  0x3b   : > { %v160_v13 = vsel %vm154_vm0, %v158_v3, %v159_v4  ;;  %v209_v14 = vsel %vm187_vm1, 0.0, %v191_v5  ;;  %v176_v15 = vsel %vm154_vm0, %v159_v4, 0.0  ;;  %v162_v16 = vrot.slane %v748_v12, 1  ;;  %v766_v26 = vld [vmem:[%s721_s30 + $0x38] sm:$0xff]  ;;  %v773_v30 = vld [vmem:[%s721_s30 + $0x30] sm:$0xff]  ;;  %s597_s25 = smov 1  }
  0x3c   : > { %v181_v17 = vadd.f32 %v160_v13, %v728_v0  ;;  %v157_v18 = vsel %vm154_vm0, %v155_v7, %v156_v8  ;;  %v208_v19 = vsel %vm187_vm1, 0.0, %v188_v9  ;;  %v182_v20 = vadd.f32 %v176_v15, %v731_v1  ;;  %s832_s27 = scalar_lea.vmem [#allocation5], %s431_s24  ;;  %s442_s28 = sshll.u32 %s632_s10, 10 }
  0x3d   : > { %v179_v21 = vadd.f32 %v157_v18, %v734_v2  ;;  %v193_v22 = vsel %vm187_vm1, %v191_v5, %v192_v10  ;;  %v175_v23 = vsel %vm154_vm0, %v156_v8, 0.0  ;;  %v190_v24 = vsel %vm187_vm1, %v188_v9, %v189_v11  ;;  %s350_s29 = sshll.u32 %s832_s27, 4  ;;  %s866_s4 = scalar_lea.hbm %s917_s1, %s442_s28  ;;  %s868_s29 = int_to_ptr.vmem [resolvable:$true] %s350_s29 }
  0x3e   : > { %v768_v27 = vadd.f32 %v209_v14, %v181_v17  ;;  %v180_v28 = vadd.f32 %v175_v23, %v740_v6  ;;  %v177_v29 = vsel %vm154_vm0, %v162_v16, 0.0  ;;  %v775_v32 = vadd.f32 %v193_v22, %v182_v20  ;;  %s336_s10 = scalar_lea.sflag [#allocation4], %s715_s23  ;;  %s525_s5 = scalar_lea.vmem %s868_s29, 1024 }
  0x3f   : > { %v212_v31 = vadd.f32 %v208_v19, %v179_v21  ;;  %v194_v33 = vrot.slane %v763_v25, 7  ;;  %v195_v34 = vrot.slane %v748_v12, 7  ;;  %v184_v36 = vadd.f32 %v177_v29, %v748_v12  ;;  %p526_p6 = scmp.ne.s32.totalorder %s868_s29, %s525_s5  ;;  %p924_p11 = scmp.ne.s32.totalorder %s921_s18, 0 }
  0x40   : > { %232 = vrot.lane.b32.xlu1 %v768_v27, %s596_s17  ;;  %v213_v35 = vadd.f32 %v190_v24, %v180_v28  ;;  %v161_v37 = vrot.slane %v763_v25, 1  ;;  %v165_v38 = vrot.slane %v766_v26, 1  ;;  %v197_v40 = vrot.slane %v773_v30, 7  ;;  %s598_s11 = smov [#allocation5]  }
  0x41   : > { %228 = vrot.lane.b32.xlu0 %v212_v31, %s596_s17  ;;  %v196_v39 = vsel %vm187_vm1, %v194_v33, %v195_v34  ;;  %v198_v41 = vrot.slane %v766_v26, 7  ;;  %v164_v42 = vrot.slane %v773_v30, 1  ;;  %v210_v44 = vsel %vm187_vm1, 0.0, %v194_v33  ;;  %p527_p12 = pnand %p526_p6, %p924_p11  ;;  %s529_s13 = sshll.u32 %s598_s11, 4  ;;  %s530_s13 = int_to_ptr.vmem [resolvable:$false] %s529_s13 }
  0x42   : > { %v163_v43 = vsel %vm154_vm0, %v161_v37, %v162_v16  ;;  %v178_v45 = vsel %vm154_vm0, %v165_v38, 0.0  ;;  %v793_v48 = vadd.f32 %v196_v39, %v184_v36  ;;  %v211_v53 = vsel %vm187_vm1, 0.0, %v197_v40  ;;  %s531_s14 = scalar_lea.vmem %s530_s13, 2048  ;;  %p532_p8 = scmp.lt.s32.totalorder %s868_s29, %s530_s13 }
  0x43   : > { %v183_v46 = vadd.f32 %v163_v43, %v763_v25  ;;  %v166_v47 = vsel %vm154_vm0, %v164_v42, %v165_v38  ;;  %v186_v49 = vadd.f32 %v178_v45, %v766_v26  ;;  %v199_v51 = vsel %vm187_vm1, %v197_v40, %v198_v41  ;;  %p528_p13 = pneg %p527_p12  ;;  %p533_p10 = scmp.lt.s32.totalorder %s531_s14, %s525_s5 }
  0x44   : > { %234 = vrot.lane.b32.xlu1 %v775_v32, %s596_s17  ;;  %v185_v52 = vadd.f32 %v166_v47, %v773_v30  ;;  %vm252_vm2 = vcmask 121856   ;;  %vm293_vm3 = vcmask 7168   ;;  %v311_v7 = vmul.f32 9.0, %v740_v6 }
  0x45   : > { %230 = vrot.lane.b32.xlu0 %v213_v35, %s596_s17  ;;  %v796_v50 = vadd.f32 %v210_v44, %v183_v46  ;;  %v802_v54 = vadd.f32 %v199_v51, %v186_v49  ;;  %v310_v13 = vmul.f32 9.0, %v734_v2  ;;  %vm326_vm4 = vcmask 130048   ;;  %p534_p0 = por %p533_p10, %p532_p8 }
  0x46   : > { %v805_v55 = vadd.f32 %v211_v53, %v185_v52  ;;  %v313_v20 = vmul.f32 9.0, %v731_v1  ;;  %v312_v22 = vmul.f32 9.0, %v728_v0  ;;  %v315_v34 = vmul.f32 9.0, %v748_v12 }
  0x47   : > { %v314_v36 = vmul.f32 9.0, %v763_v25  ;;  %v317_v46 = vmul.f32 9.0, %v766_v26  ;;  %v316_v51 = vmul.f32 9.0, %v773_v30  ;;  %p535_p2 = pnand %p534_p0, %p528_p13 }
  0x48   : > { %238 = vrot.lane.b32.xlu1 %v793_v48, %s596_s17 }
  0x49   : > { %236 = vrot.lane.b32.xlu0 %v796_v50, %s596_s17 }
  0x4c   : > { %242 = vrot.lane.b32.xlu1 %v802_v54, %s596_s17 }
  0x4d   : > { %240 = vrot.lane.b32.xlu0 %v805_v55, %s596_s17 }
  0x50   : > { %271 = vrot.lane.b32.xlu1 %v213_v35, %s597_s25 }
  0x51   : > { %269 = vrot.lane.b32.xlu0 %v212_v31, %s597_s25 }
  0x54   : > { %275 = vrot.lane.b32.xlu1 %v775_v32, %s597_s25 }
  0x55   : > { %273 = vrot.lane.b32.xlu0 %v768_v27, %s597_s25 }
  0x58   : > { %279 = vrot.lane.b32.xlu1 %v793_v48, %s597_s25 }
  0x59   : > { %277 = vrot.lane.b32.xlu0 %v796_v50, %s597_s25 }
  0x5c   : > { %283 = vrot.lane.b32.xlu1 %v802_v54, %s597_s25 }
  0x5d   : > { %281 = vrot.lane.b32.xlu0 %v805_v55, %s597_s25 }
  0xb2   : > { %v233_v56 = vpop.permute.xlu1 %232 }
  0xb3   : > { %v229_v57 = vpop.permute.xlu0 %228  ;;  %v255_v15 = vsel %vm252_vm2, %v233_v56, 0.0 }
  0xb4   : > { %v253_v4 = vsel %vm252_vm2, %v229_v57, 0.0  ;;  %v263_v23 = vadd.f32 %v255_v15, %v768_v27 }
  0xb5   : > { %v261_v9 = vadd.f32 %v253_v4, %v212_v31 }
  0xb6   : > { %v235_v58 = vpop.permute.xlu1 %234 }
  0xb7   : > { %v231_v59 = vpop.permute.xlu0 %230  ;;  %v256_v10 = vsel %vm252_vm2, %v235_v58, 0.0 }
  0xb8   : > { %v254_v63 = vsel %vm252_vm2, %v231_v59, 0.0  ;;  %v264_v19 = vadd.f32 %v256_v10, %v775_v32 }
  0xb9   : > { %v262_v5 = vadd.f32 %v254_v63, %v213_v35 }
  0xba   : > { %v239_v60 = vpop.permute.xlu1 %238 }
  0xbb   : > { %v237_v61 = vpop.permute.xlu0 %236  ;;  %v258_v2 = vsel %vm252_vm2, %v239_v60, 0.0 }
  0xbc   : > { %v257_v31 = vsel %vm252_vm2, %v237_v61, 0.0  ;;  %v266_v32 = vadd.f32 %v258_v2, %v793_v48 }
  0xbd   : > { %v265_v37 = vadd.f32 %v257_v31, %v796_v50 }
  0xbe   : > { %v243_v62 = vpop.permute.xlu1 %242 }
  0xbf   : > { %v241_v3 = vpop.permute.xlu0 %240  ;;  %v260_v38 = vsel %vm252_vm2, %v243_v62, 0.0 }
  0xc0   : > { %v259_v42 = vsel %vm252_vm2, %v241_v3, 0.0  ;;  %v268_v44 = vadd.f32 %v260_v38, %v802_v54 }
  0xc1   : > { %v267_v48 = vadd.f32 %v259_v42, %v805_v55 }
  0xc2   : > { %v272_v8 = vpop.permute.xlu1 %271 }
  0xc3   : > { %v295_v11 = vsel %vm293_vm3, 0.0, %v272_v8  ;;  %v270_v14 = vpop.permute.xlu0 %269 }
  0xc4   : > { %v303_v16 = vadd.f32 %v295_v11, %v262_v5  ;;  %v294_v17 = vsel %vm293_vm3, 0.0, %v270_v14 }
  0xc5   : > { %v302_v18 = vadd.f32 %v294_v17, %v261_v9 }
  0xc6   : > { %v319_v6 = vsub.f32 %v311_v7, %v303_v16  ;;  %v276_v21 = vpop.permute.xlu1 %275 }
  0xc7   : > { %v318_v24 = vsub.f32 %v310_v13, %v302_v18  ;;  %v297_v28 = vsel %vm293_vm3, 0.0, %v276_v21  ;;  %v274_v29 = vpop.permute.xlu0 %273 }
  0xc8   : > { %328 = vst.msk [vmem:[%s832_s27 + $0x8] sm:$0xff] %vm326_vm4, %v319_v6  ;;  %v305_v1 = vadd.f32 %v297_v28, %v264_v19  ;;  %v296_v0 = vsel %vm293_vm3, 0.0, %v274_v29 }
  0xc9   : > { %327 = vst.msk [vmem:[%s832_s27] sm:$0xff] %vm326_vm4, %v318_v24  ;;  %v304_v27 = vadd.f32 %v296_v0, %v263_v23 }
  0xca   : > { %v321_v33 = vsub.f32 %v313_v20, %v305_v1  ;;  %v280_v35 = vpop.permute.xlu1 %279 }
  0xcb   : > { %v320_v39 = vsub.f32 %v312_v22, %v304_v27  ;;  %v299_v40 = vsel %vm293_vm3, 0.0, %v280_v35  ;;  %v278_v41 = vpop.permute.xlu0 %277 }
  0xcc   : > { %330 = vst.msk [vmem:[%s832_s27 + $0x18] sm:$0xff] %vm326_vm4, %v321_v33  ;;  %v307_v43 = vadd.f32 %v299_v40, %v266_v32  ;;  %v298_v12 = vsel %vm293_vm3, 0.0, %v278_v41 }
  0xcd   : > { %329 = vst.msk [vmem:[%s832_s27 + $0x10] sm:$0xff] %vm326_vm4, %v320_v39  ;;  %v306_v25 = vadd.f32 %v298_v12, %v265_v37 }
  0xce   : > { %v323_v45 = vsub.f32 %v315_v34, %v307_v43  ;;  %v284_v47 = vpop.permute.xlu1 %283 }
  0xcf   : > { %v322_v49 = vsub.f32 %v314_v36, %v306_v25  ;;  %v301_v50 = vsel %vm293_vm3, 0.0, %v284_v47  ;;  %v282_v52 = vpop.permute.xlu0 %281 }
  0xd0   : > { %332 = vst.msk [vmem:[%s832_s27 + $0x28] sm:$0xff] %vm326_vm4, %v323_v45  ;;  %v309_v53 = vadd.f32 %v301_v50, %v268_v44  ;;  %v300_v26 = vsel %vm293_vm3, 0.0, %v282_v52 }
  0xd1   : > { %331 = vst.msk [vmem:[%s832_s27 + $0x20] sm:$0xff] %vm326_vm4, %v322_v49  ;;  %v308_v54 = vadd.f32 %v300_v26, %v267_v48 }
  0xd2   : > { %v325_v55 = vsub.f32 %v317_v46, %v309_v53 }
  0xd3   : > { %v324_v30 = vsub.f32 %v316_v51, %v308_v54 }
  0xd4   : > { %334 = vst.msk [vmem:[%s832_s27 + $0x38] sm:$0xff] %vm326_vm4, %v325_v55 }
  0xd5   : > { %333 = vst.msk [vmem:[%s832_s27 + $0x30] sm:$0xff] %vm326_vm4, %v324_v30 }
  0xd6   : > { %538 = shalt.err (!%p535_p2)
}
  0xd7   : > { %s539_s16 = scalar_lea.hbm %s866_s4, 1024  ;;  %s543_s22 = scalar_lea.hbm %s917_s1, 2048 }
  0xd8   : > { %p540_p4 = scmp.ne.s32.totalorder %s866_s4, %s539_s16  ;;  %p544_p9 = scmp.lt.u32.totalorder %s866_s4, %s917_s1 }
  0xd9   : > { %p545_p1 = scmp.lt.u32.totalorder %s543_s22, %s539_s16  ;;  %p547_p6 = scmp.lt.u32.totalorder %s539_s16, %s866_s4 }
  0xda   : > { %p541_p5 = pnand %p540_p4, %p924_p11 }
  0xdb   : > { %p546_p3 = por %p545_p1, %p544_p9 }
  0xdc   : > { %p542_p7 = pneg %p541_p5 }
  0xdd   : > { %p548_p12 = por %p547_p6, %p546_p3 }
  0xdf   : > { %p549_p13 = pnand %p548_p12, %p542_p7 }
  0xe1   : > { %552 = shalt.err (!%p549_p13)
}
  0xe2   : > { %s599_s30 = smov 128   ;;  %s600_s17 = smov 8  }
  0xe3   : > { %445 = dma.vmem_to_hbm [thread:$0]  (%p924_p11), %s868_s29, 1024, %s866_s4, %s336_s10, %s599_s30, %s599_s30, %s600_s17  }
  0xe4 PF: > { %s365_s25 = sand.u32 1, %s579_s6   ;;  %p925_p8 = scmp.ne.s32.totalorder %s922_s19, 0 }
  0xe5   : > { %p926_p10 = scmp.ge.s32.totalorder %s591_s9, 2  ;;  %s366_s27 = scalar_lea.sflag [#allocation4], %s365_s25 }
  0xe7   : > { %p452_p0 = pnand %p926_p10, %p925_p8 }
  0xe9   : > { %574 = dma.done.wait (!%p452_p0), %s366_s27, 1024  }
  0xea   : > { %576 = vsyncadd (!%p452_p0), %s366_s27, 4294966272  ;;  %p14_p2 = scmp.ge.s32.totalorder %s636_s12, 4   ;;  %s927_s6 = smov %s583_s7 }
  0xeb   : > { %s928_s7 = smov %s587_s8  ;;  %s929_s8 = smov %s648_s15 }
  0xec   : > { %s930_s9 = smov %s636_s12  ;;  %16 = sbr.rel (!%p14_p2) target bundleno = 5 (0x5), region = 69 }
  0xf3   :  { %371 = vsyncpa [#allocation3], 1 }
  0xf4   :  { %373 = vsyncpa [#allocation3 + $0x1], 1 }
  0xf5   :  { %374 = vsyncpa [#allocation4], 1 }
  0xf6   :  { %376 = vsyncpa [#allocation4 + $0x1], 1 }

</bundles_post_ra>
